<compile_context>
chip_gen: v7x
topology: tpu7x:2x2x1
jax: 0.10.0
libtpu: 0.0.40
codegen_flags: <defaults>
</compile_context>

<pallas_src>
import math
import functools

import jax
import jax.numpy as jnp
from jax.experimental import pallas as pl
from jax.experimental.pallas import tpu as pltpu


_NEG_INF = -1e30  # large finite negative; avoids inf/nan corner cases


def _pick_tile(dim, target):
    """Use `target` if it divides `dim`, else fall back to the full extent."""
    return target if dim % target == 0 else dim


# ---------------------------------------------------------------------------
# Pallas kernels
# ---------------------------------------------------------------------------

def _linear_kernel(x_ref, w_ref, b_ref, o_ref, acc_ref, *, compute_dtype):
    """Tiled o = x @ w + b with f32 accumulation over the K grid axis."""
    k = pl.program_id(2)

    @pl.when(k == 0)
    def _():
        acc_ref[...] = jnp.zeros(acc_ref.shape, acc_ref.dtype)

    acc_ref[...] += jnp.dot(
        x_ref[...].astype(compute_dtype),
        w_ref[...].astype(compute_dtype),
        preferred_element_type=jnp.float32,
    )

    @pl.when(k == pl.num_programs(2) - 1)
    def _():
        o_ref[...] = (acc_ref[...] + b_ref[...].astype(jnp.float32)).astype(o_ref.dtype)


def _flash_attn_kernel(q_ref, k_ref, v_ref, cos_q_ref, sin_q_ref,
                       cos_k_ref, sin_k_ref, o_ref,
                       m_sc, l_sc, acc_sc, *, scale, compute_dtype):
    """Flash attention for one (batch*head, q-tile) over the kv-tile grid axis.

    q_ref: (tq, D)   k_ref/v_ref: (tkv, D)   cos/sin: per-tile (.., D).
    Causal mask is generated in-kernel; RoPE applied to q and k tiles.
    """
    qi = pl.program_id(1)
    ki = pl.program_id(2)
    tq, d = q_ref.shape
    tkv = k_ref.shape[0]

    @pl.when(ki == 0)
    def _():
        m_sc[...] = jnp.full(m_sc.shape, _NEG_INF, dtype=m_sc.dtype)
        l_sc[...] = jnp.zeros(l_sc.shape, l_sc.dtype)
        acc_sc[...] = jnp.zeros(acc_sc.shape, acc_sc.dtype)

    # Causal block skipping: this kv tile contributes only if its first key
    # position is <= the last query position of the q tile.
    @pl.when(ki * tkv <= qi * tq + (tq - 1))
    def _():
        q = q_ref[...].astype(jnp.float32)
        k = k_ref[...].astype(jnp.float32)

        half = d // 2

        def rope(x, cos, sin):
            # rotate_half(x) = concat(-x2, x1)
            rot = jnp.concatenate([-x[:, half:], x[:, :half]], axis=-1)
            return x * cos + rot * sin

        q = rope(q, cos_q_ref[...], sin_q_ref[...]).astype(compute_dtype)
        k = rope(k, cos_k_ref[...], sin_k_ref[...]).astype(compute_dtype)

        # NT matmul: contract the last dim of both operands (no k.T transpose).
        s = jax.lax.dot_general(
            q, k, (((1,), (1,)), ((), ())),
            preferred_element_type=jnp.float32) * scale

        rows = qi * tq + jax.lax.broadcasted_iota(jnp.int32, (tq, tkv), 0)
        cols = ki * tkv + jax.lax.broadcasted_iota(jnp.int32, (tq, tkv), 1)
        s = jnp.where(rows >= cols, s, _NEG_INF)

        m_prev = m_sc[...]
        m_new = jnp.maximum(m_prev, jnp.max(s, axis=-1, keepdims=True))
        alpha = jnp.exp(m_prev - m_new)
        p = jnp.exp(s - m_new)

        l_sc[...] = alpha * l_sc[...] + jnp.sum(p, axis=-1, keepdims=True)
        acc_sc[...] = alpha * acc_sc[...] + jnp.dot(
            p.astype(compute_dtype),
            v_ref[...].astype(compute_dtype),
            preferred_element_type=jnp.float32)
        m_sc[...] = m_new

    @pl.when(ki == pl.num_programs(2) - 1)
    def _():
        inv_l = pl.reciprocal(l_sc[...], approx=True)
        o_ref[...] = (acc_sc[...] * inv_l).astype(o_ref.dtype)


# ---------------------------------------------------------------------------
# Wrappers
# ---------------------------------------------------------------------------

def pallas_linear(x2d, w, b, *, compute_dtype=None, tm=256, tn=256, tk=256):
    """Tiled, pipelined o = x2d @ w + b."""
    M, K = x2d.shape
    N = w.shape[1]
    if compute_dtype is None:
        compute_dtype = x2d.dtype
    tm = _pick_tile(M, tm)
    tn = _pick_tile(N, tn)
    tk = _pick_tile(K, tk)
    kernel = functools.partial(_linear_kernel, compute_dtype=compute_dtype)
    return pl.pallas_call(
        kernel,
        out_shape=jax.ShapeDtypeStruct((M, N), x2d.dtype),
        grid_spec=pltpu.PrefetchScalarGridSpec(
            num_scalar_prefetch=0,
            grid=(M // tm, N // tn, K // tk),
            in_specs=[
                pl.BlockSpec((tm, tk), lambda i, j, k: (i, k)),
                pl.BlockSpec((tk, tn), lambda i, j, k: (k, j)),
                pl.BlockSpec((1, tn), lambda i, j, k: (0, j)),
            ],
            out_specs=pl.BlockSpec((tm, tn), lambda i, j, k: (i, j)),
            scratch_shapes=[pltpu.VMEM((tm, tn), jnp.float32)],
        ),
        compiler_params=pltpu.CompilerParams(
            dimension_semantics=("parallel", "parallel", "arbitrary"),
            vmem_limit_bytes=32 * 1024 * 1024,  # safe on v7x (64 MiB physical)
        ),
    )(x2d, w, b.reshape(1, N))


def pallas_flash_attention(q, k, v, cos, sin, *, compute_dtype=None,
                           tq=256, tkv=256):
    """q, k, v: (B*H, T, D); cos/sin: (T, D). Causal flash attention + RoPE."""
    BH, T, D = q.shape
    if compute_dtype is None:
        compute_dtype = q.dtype
    tq = _pick_tile(T, tq)
    tkv = _pick_tile(T, tkv)
    scale = 1.0 / math.sqrt(D)
    kernel = functools.partial(_flash_attn_kernel, scale=scale,
                               compute_dtype=compute_dtype)
    return pl.pallas_call(
        kernel,
        out_shape=jax.ShapeDtypeStruct((BH, T, D), q.dtype),
        grid_spec=pltpu.PrefetchScalarGridSpec(
            num_scalar_prefetch=0,
            grid=(BH, T // tq, T // tkv),
            in_specs=[
                pl.BlockSpec((None, tq, D), lambda bh, qi, ki: (bh, qi, 0)),   # q
                pl.BlockSpec((None, tkv, D), lambda bh, qi, ki: (bh, ki, 0)),  # k
                pl.BlockSpec((None, tkv, D), lambda bh, qi, ki: (bh, ki, 0)),  # v
                pl.BlockSpec((tq, D), lambda bh, qi, ki: (qi, 0)),             # cos (q rows)
                pl.BlockSpec((tq, D), lambda bh, qi, ki: (qi, 0)),             # sin (q rows)
                pl.BlockSpec((tkv, D), lambda bh, qi, ki: (ki, 0)),            # cos (k rows)
                pl.BlockSpec((tkv, D), lambda bh, qi, ki: (ki, 0)),            # sin (k rows)
            ],
            out_specs=pl.BlockSpec((None, tq, D), lambda bh, qi, ki: (bh, qi, 0)),
            scratch_shapes=[
                pltpu.VMEM((tq, 1), jnp.float32),   # running max m
                pltpu.VMEM((tq, 1), jnp.float32),   # running sum l
                pltpu.VMEM((tq, D), jnp.float32),   # output accumulator
            ],
        ),
        compiler_params=pltpu.CompilerParams(
            dimension_semantics=("parallel", "parallel", "arbitrary"),
            vmem_limit_bytes=32 * 1024 * 1024,
        ),
    )(q, k, v, cos, sin, cos, sin)


def rotary_pos(T, D):
    """RotaryEmbedding.forward(T): (T, D) with freqs repeated on the last dim."""
    inv_freq = 1.0 / (10000.0 ** (jnp.arange(0, D, 2, dtype=jnp.float32) / D))
    t = jnp.arange(T, dtype=jnp.float32)
    freqs = jnp.einsum("i,j->ij", t, inv_freq)
    return jnp.concatenate([freqs, freqs], axis=-1)


def hrom_attention_forward(x, params, n_heads, *, compute_dtype=None):
    """Pallas-backed HROMAttention.forward (eval mode, causal mask in-kernel)."""
    B, T, C = x.shape
    H = n_heads
    D = C // H
    if compute_dtype is None:
        compute_dtype = x.dtype

    # QKV projection (tiled Pallas matmul)
    qkv = pallas_linear(x.reshape(B * T, C), params["w_qkv"], params["b_qkv"],
                        compute_dtype=compute_dtype)
    qkv = qkv.reshape(B, T, 3, H, D)

    # TODO(synk): these head transposes are XLA-level copies; folding them into
    # BlockSpec index maps (fused-head lane-dense layout) is a further step.
    def to_heads(t):
        return t.transpose(0, 2, 1, 3).reshape(B * H, T, D)

    q = to_heads(qkv[:, :, 0])
    k = to_heads(qkv[:, :, 1])
    v = to_heads(qkv[:, :, 2])

    pos = rotary_pos(T, D)
    cos, sin = jnp.cos(pos), jnp.sin(pos)

    out = pallas_flash_attention(q, k, v, cos, sin,
                                 compute_dtype=compute_dtype)   # (B*H, T, D)
    out = out.reshape(B, H, T, D).transpose(0, 2, 1, 3).reshape(B * T, C)

    # Output projection (tiled Pallas matmul)
    out = pallas_linear(out, params["w_proj"], params["b_proj"],
                        compute_dtype=compute_dtype)
    return out.reshape(B, T, C)


# ---------------------------------------------------------------------------
# Pure-JAX reference (mirrors the PyTorch code) for a sanity check
# ---------------------------------------------------------------------------

def _rotate_half_ref(x):
    x1, x2 = jnp.split(x, 2, axis=-1)
    return jnp.concatenate([-x2, x1], axis=-1)


def reference_forward(x, mask, params, n_heads):
    B, T, C = x.shape
    H = n_heads
    D = C // H
    qkv = x.reshape(B * T, C) @ params["w_qkv"] + params["b_qkv"]
    qkv = qkv.reshape(B, T, 3, H, D)
    q, k, v = qkv[:, :, 0], qkv[:, :, 1], qkv[:, :, 2]
    q = q.transpose(0, 2, 1, 3)
    k = k.transpose(0, 2, 1, 3)
    v = v.transpose(0, 2, 1, 3)
    pos = rotary_pos(T, D)[None, None]          # (1,1,T,D)
    cos, sin = jnp.cos(pos), jnp.sin(pos)
    q = q * cos + _rotate_half_ref(q) * sin
    k = k * cos + _rotate_half_ref(k) * sin
    scores = jnp.einsum("bhqd,bhkd->bhqk", q, k) / math.sqrt(D)
    scores = scores + mask[:, None]              # (B,1,T,T) broadcast over heads
    probs = jax.nn.softmax(scores.astype(jnp.float32), axis=-1).astype(x.dtype)
    out = jnp.einsum("bhqk,bhkd->bhqd", probs, v)
    out = out.transpose(0, 2, 1, 3).reshape(B, T, C)
    return (out.reshape(B * T, C) @ params["w_proj"] + params["b_proj"]).reshape(B, T, C)


# ---------------------------------------------------------------------------
# Main
# ---------------------------------------------------------------------------

if __name__ == "__main__":
    # Small config consistent with the module (dim divisible by n_heads).
    B, T, DIM, N_HEADS = 2, 16, 64, 4

    key = jax.random.PRNGKey(0)
    kx, kw1, kb1, kw2, kb2 = jax.random.split(key, 5)

    bound = 1.0 / math.sqrt(DIM)
    params = {
        "w_qkv": jax.random.uniform(kw1, (DIM, 3 * DIM), jnp.float32, -bound, bound),
        "b_qkv": jax.random.uniform(kb1, (3 * DIM,), jnp.float32, -bound, bound),
        "w_proj": jax.random.uniform(kw2, (DIM, DIM), jnp.float32, -bound, bound),
        "b_proj": jax.random.uniform(kb2, (DIM,), jnp.float32, -bound, bound),
    }

    x = jax.random.normal(kx, (B, T, DIM), jnp.float32)

    # Pallas path: causal mask generated in-kernel.
    out = hrom_attention_forward(x, params, N_HEADS, compute_dtype=jnp.float32)
    out = jax.block_until_ready(out)

    # Reference path with an explicit additive causal mask (PyTorch convention).
    causal = jnp.where(
        jnp.arange(T)[:, None] >= jnp.arange(T)[None, :], 0.0, -1e9
    ).astype(jnp.float32)
    mask = jnp.broadcast_to(causal, (B, T, T))
    ref = reference_forward(x, mask, params, N_HEADS)

    assert out.shape == (B, T, DIM)
    # 2e-3 tolerance: approx EUP reciprocal in the softmax epilogue.
    assert jnp.allclose(out, ref, atol=2e-3, rtol=2e-3), "mismatch vs reference"

    print("KERNEL_OK")
</pallas_src>

<mosaic_0001>
module attributes {stable_mosaic.version = 11 : i64} {
  func.func @_linear_kernel(%arg0: i32, %arg1: i32, %arg2: i32, %arg3: memref<32x64xf32, #tpu.memory_space<vmem>>, %arg4: memref<64x192xf32, #tpu.memory_space<vmem>>, %arg5: memref<1x192xf32, #tpu.memory_space<vmem>>, %arg6: memref<32x192xf32, #tpu.memory_space<vmem>>, %arg7: memref<32x192xf32, #tpu.memory_space<vmem>>) attributes {dimension_semantics = [#tpu.dimension_semantics<parallel>, #tpu.dimension_semantics<parallel>, #tpu.dimension_semantics<arbitrary>], iteration_bounds = array<i64: 1, 1, 1>, scalar_prefetch = 0 : i64, scratch_operands = 1 : i64, tpu.core_type = #tpu.core_type<tc>, window_params = [{transform_indices = @transform_0, window_bounds = array<i64: 32, 64>}, {transform_indices = @transform_1, window_bounds = array<i64: 64, 192>}, {transform_indices = @transform_2, window_bounds = array<i64: 1, 192>}, {transform_indices = @transform_3, window_bounds = array<i64: 32, 192>}]} {
    %c0_i32 = arith.constant 0 : i32
    %0 = arith.cmpi eq, %arg2, %c0_i32 : i32
    %1 = arith.extui %0 : i1 to i32
    %c0_i32_0 = arith.constant 0 : i32
    %2 = arith.cmpi ne, %1, %c0_i32_0 : i32
    scf.if %2 {
      %cst_10 = arith.constant 0.000000e+00 : f32
      %12 = vector.broadcast %cst_10 : f32 to vector<32x192xf32>
      %c0_11 = arith.constant 0 : index
      %c0_12 = arith.constant 0 : index
      %13 = vector.load %arg7[%c0_11, %c0_12] : memref<32x192xf32, #tpu.memory_space<vmem>>, vector<32x192xf32>
      tpu.vector_store %arg7[%c0_11, %c0_12], %12 {strides = array<i32>} : memref<32x192xf32, #tpu.memory_space<vmem>>, vector<32x192xf32>,
    } else {
    }
    %c0 = arith.constant 0 : index
    %c0_1 = arith.constant 0 : index
    %3 = vector.load %arg7[%c0, %c0_1] : memref<32x192xf32, #tpu.memory_space<vmem>>, vector<32x192xf32>
    %c0_2 = arith.constant 0 : index
    %c0_3 = arith.constant 0 : index
    %4 = vector.load %arg3[%c0_2, %c0_3] : memref<32x64xf32, #tpu.memory_space<vmem>>, vector<32x64xf32>
    %c0_4 = arith.constant 0 : index
    %c0_5 = arith.constant 0 : index
    %5 = vector.load %arg4[%c0_4, %c0_5] : memref<64x192xf32, #tpu.memory_space<vmem>>, vector<64x192xf32>
    %cst = arith.constant dense<0.000000e+00> : vector<32x192xf32>
    %6 = tpu.matmul %4, %5, %cst {dimension_numbers = #tpu.dot_dimension_numbers<[1], [0], [0], [1], [0, 0, 1, 1], [], []>} : vector<32x64xf32>, vector<64x192xf32>, vector<32x192xf32> -> vector<32x192xf32>
    %7 = arith.addf %3, %6 : vector<32x192xf32>
    %c0_6 = arith.constant 0 : index
    %c0_7 = arith.constant 0 : index
    %8 = vector.load %arg7[%c0_6, %c0_7] : memref<32x192xf32, #tpu.memory_space<vmem>>, vector<32x192xf32>
    tpu.vector_store %arg7[%c0_6, %c0_7], %7 {strides = array<i32>} : memref<32x192xf32, #tpu.memory_space<vmem>>, vector<32x192xf32>,
    %c0_i32_8 = arith.constant 0 : i32
    %9 = arith.cmpi eq, %arg2, %c0_i32_8 : i32
    %10 = arith.extui %9 : i1 to i32
    %c0_i32_9 = arith.constant 0 : i32
    %11 = arith.cmpi ne, %10, %c0_i32_9 : i32
    scf.if %11 {
      %c0_10 = arith.constant 0 : index
      %c0_11 = arith.constant 0 : index
      %12 = vector.load %arg7[%c0_10, %c0_11] : memref<32x192xf32, #tpu.memory_space<vmem>>, vector<32x192xf32>
      %c0_12 = arith.constant 0 : index
      %c0_13 = arith.constant 0 : index
      %13 = vector.load %arg5[%c0_12, %c0_13] : memref<1x192xf32, #tpu.memory_space<vmem>>, vector<1x192xf32>
      %14 = vector.broadcast %13 : vector<1x192xf32> to vector<32x192xf32>
      %15 = arith.addf %12, %14 : vector<32x192xf32>
      %c0_14 = arith.constant 0 : index
      %c0_15 = arith.constant 0 : index
      %16 = vector.load %arg6[%c0_14, %c0_15] : memref<32x192xf32, #tpu.memory_space<vmem>>, vector<32x192xf32>
      tpu.vector_store %arg6[%c0_14, %c0_15], %15 {strides = array<i32>} : memref<32x192xf32, #tpu.memory_space<vmem>>, vector<32x192xf32>,
    } else {
    }
    return
  }
  func.func @transform_0(%arg0: i32, %arg1: i32, %arg2: i32) -> (i32, i32) {
    %c0_i32 = arith.constant 0 : i32
    return %arg0, %arg2 : i32, i32
  }
  func.func @transform_1(%arg0: i32, %arg1: i32, %arg2: i32) -> (i32, i32) {
    %c0_i32 = arith.constant 0 : i32
    return %arg2, %arg1 : i32, i32
  }
  func.func @transform_2(%arg0: i32, %arg1: i32, %arg2: i32) -> (i32, i32) {
    %c0_i32 = arith.constant 0 : i32
    %c0_i32_0 = arith.constant 0 : i32
    return %c0_i32, %arg1 : i32, i32
  }
  func.func @transform_3(%arg0: i32, %arg1: i32, %arg2: i32) -> (i32, i32) {
    %c0_i32 = arith.constant 0 : i32
    return %arg0, %arg1 : i32, i32
  }
}

</mosaic_0001>

<bundles_post_ra>
// kernel: tpu_custom_call.1
= control target key start
LH: loop header
LB: loop body
LE: loop exit
PB: predicated region body
PF: predicated region fallthrough
CT: control target
= control target key end

     0   :  { %8 = vsyncpa [#allocation4], 0  ;;  %s456_s0 = inlined_call_operand.hbm [shape: f32[32,64], index: 0, kind: input, shape index: {}]   ;;  %s457_s1 = inlined_call_operand.hbm [shape: f32[64,192], index: 1, kind: input, shape index: {}]   ;;  %s458_s2 = inlined_call_operand.vmem [shape: f32[1,192], index: 2, kind: input, shape index: {}]   ;;  %s459_s3 = inlined_call_operand.hbm [shape: f32[32,192], index: 3, kind: output, shape index: {}]  }
   0x1   :  { %9 = vsyncpa [#allocation7], 0 }
   0x2   :  { %10 = vsyncpa [#allocation5], 0  ;;  %s367_s12 = smov [#allocation3]   ;;  %s295_s16 = scalar_lea.hbm %s456_s0, 512 }
   0x3   :  { %s16_s13 = sshll.u32 %s367_s12, 4  ;;  %p296_p0 = scmp.ne.s32.totalorder %s456_s0, %s295_s16  ;;  %s17_s13 = int_to_ptr.vmem [resolvable:$true] %s16_s13 }
   0x4   :  { %p299_p1 = scmp.lt.u32.totalorder %s295_s16, %s456_s0 }
   0x6   :  { %p301_p2 = pnand %p299_p1, %p296_p0 }
   0x8   :  { %304 = shalt.err (!%p301_p2)
}
   0x9   :  { %s305_s21 = scalar_lea.vmem %s17_s13, 512  ;;  %p310_p4 = scmp.lt.s32.totalorder %s17_s13, %s17_s13 }
   0xa   :  { %p306_p3 = scmp.ne.s32.totalorder %s17_s13, %s305_s21  ;;  %p311_p5 = scmp.lt.s32.totalorder %s305_s21, %s305_s21 }
   0xc   :  { %p312_p6 = por %p311_p5, %p310_p4 }
   0xe   :  { %p313_p7 = pnand %p312_p6, %p306_p3 }
  0x10   :  { %316 = shalt.err (!%p313_p7)
}
  0x11   :  { %s368_s22 = smov 128   ;;  %s369_s23 = smov 8  }
  0x12   :  { %22 = dma.hbm_to_vmem [thread:$0]  %s456_s0, 512, %s17_s13, [#allocation4], %s368_s22, %s368_s22, %s369_s23  }
  0x13   :  { %s370_s26 = smov [#allocation6]   ;;  %s317_s30 = scalar_lea.hbm %s457_s1, 2048 }
  0x14   :  { %s28_s27 = sshll.u32 %s370_s26, 4  ;;  %p318_p8 = scmp.ne.s32.totalorder %s457_s1, %s317_s30  ;;  %s29_s27 = int_to_ptr.vmem [resolvable:$true] %s28_s27 }
  0x15   :  { %p321_p9 = scmp.lt.u32.totalorder %s317_s30, %s457_s1 }
  0x17   :  { %p323_p10 = pnand %p321_p9, %p318_p8 }
  0x19   :  { %326 = shalt.err (!%p323_p10)
}
  0x1a   :  { %s327_s8 = scalar_lea.vmem %s29_s27, 2048  ;;  %p332_p12 = scmp.lt.s32.totalorder %s29_s27, %s29_s27 }
  0x1b   :  { %p328_p11 = scmp.ne.s32.totalorder %s29_s27, %s327_s8  ;;  %p333_p13 = scmp.lt.s32.totalorder %s327_s8, %s327_s8 }
  0x1d   :  { %p334_p0 = por %p333_p13, %p332_p12 }
  0x1f   :  { %p335_p1 = pnand %p334_p0, %p328_p11 }
  0x21   :  { %338 = shalt.err (!%p335_p1)
}
  0x22   :  { %s371_s0 = smov 256   ;;  %s372_s9 = smov 16  }
  0x23   :  { %34 = dma.hbm_to_vmem [thread:$0]  %s457_s1, 2048, %s29_s27, [#allocation7], %s371_s0, %s371_s0, %s372_s9  }
  0x24   :  { %361 = dma.done.wait [#allocation4], 512  }
  0x25   :  { %362 = vsyncadd [#allocation4], 4294966784 }
  0x26   :  { %363 = dma.done.wait [#allocation7], 2048  }
  0x27   :  { %364 = vsyncadd [#allocation7], 4294965248  ;;  %vm48_vm0 = vcmask 523264   ;;  %v373_v0 = vmov 0.0   ;;  %v69_v1 = vld [vmem:[#allocation6 + $0x8] sm:$0xff]  ;;  %v71_v2 = vld [vmem:[#allocation6 + $0x18] sm:$0xff]  ;;  %v215_v29 = vlaneseq }
  0x28   :  { %161 = vmatprep.mubr.f32.mxu0 %v373_v0  ;;  %173 = vmatprep.mubr.f32.mxu1 %v373_v0  ;;  %49 = vst.msk [vmem:[#allocation2 + $0x8] sm:$0xff] %vm48_vm0, %v373_v0  ;;  %51 = vst.msk [vmem:[#allocation2 + $0x18] sm:$0xff] %vm48_vm0, %v373_v0  ;;  %v68_v3 = vld [vmem:[#allocation6] sm:$0xff]  ;;  %v263_v4 = vpack.c.bf16 %v71_v2, %v69_v1  ;;  %v70_v5 = vld [vmem:[#allocation6 + $0x10] sm:$0xff] }
  0x29   :  { %53 = vst.msk [vmem:[#allocation2 + $0x28] sm:$0xff] %vm48_vm0, %v373_v0  ;;  %55 = vst.msk [vmem:[#allocation2 + $0x38] sm:$0xff] %vm48_vm0, %v373_v0  ;;  %v73_v6 = vld [vmem:[#allocation6 + $0x28] sm:$0xff]  ;;  %v75_v7 = vld [vmem:[#allocation6 + $0x38] sm:$0xff]  ;;  %v265_v8 = vpack.c.bf16 %v70_v5, %v68_v3  ;;  %v216_v30 = vshrl.u32 %v215_v29, 7 }
  0x2a   :  { %v267_v9 = vpack.c.bf16 %v75_v7, %v73_v6  ;;  %v72_v10 = vld [vmem:[#allocation6 + $0x20] sm:$0xff]  ;;  %v74_v11 = vld [vmem:[#allocation6 + $0x30] sm:$0xff]  ;;  %v77_v12 = vld [vmem:[#allocation6 + $0x48] sm:$0xff]  ;;  %264 = vmatprep.subr.bf16.mxu0 %v263_v4  ;;  %279 = vmatprep.subr.bf16.mxu1 %v263_v4 }
  0x2b   :  { %v79_v13 = vld [vmem:[#allocation6 + $0x58] sm:$0xff]  ;;  %266 = vmatpush1.bf16.msra.mxu0 %v265_v8  ;;  %283 = vmatpush1.bf16.msra.mxu1 %v265_v8  ;;  %v269_v14 = vpack.c.bf16 %v74_v11, %v72_v10  ;;  %v76_v16 = vld [vmem:[#allocation6 + $0x40] sm:$0xff]  ;;  %v78_v17 = vld [vmem:[#allocation6 + $0x50] sm:$0xff]  ;;  %v217_v31 = vsub.s32 0, %v216_v30  ;;  %v221_v48 = vsub.s32 1, %v216_v30 }
  0x2c   :  { %268 = vmatprep.subr.bf16.mxu0 %v267_v9  ;;  %280 = vmatprep.subr.bf16.mxu1 %v267_v9  ;;  %v271_v15 = vpack.c.bf16 %v79_v13, %v77_v12  ;;  %v81_v18 = vld [vmem:[#allocation6 + $0x68] sm:$0xff]  ;;  %v83_v19 = vld [vmem:[#allocation6 + $0x78] sm:$0xff]  ;;  %v273_v20 = vpack.c.bf16 %v78_v17, %v76_v16  ;;  %v80_v22 = vld [vmem:[#allocation6 + $0x60] sm:$0xff] }
  0x2d   :  { %v275_v21 = vpack.c.bf16 %v83_v19, %v81_v18  ;;  %v82_v23 = vld [vmem:[#allocation6 + $0x70] sm:$0xff]  ;;  %v64_v25 = vld [vmem:[#allocation3] sm:$0xff]  ;;  %v65_v27 = vld [vmem:[#allocation3 + $0x8] sm:$0xff] }
  0x2e   :  { %v277_v24 = vpack.c.bf16 %v82_v23, %v80_v22  ;;  %v66_v26 = vld [vmem:[#allocation3 + $0x10] sm:$0xff]  ;;  %v67_v28 = vld [vmem:[#allocation3 + $0x18] sm:$0xff]  ;;  %v213_v32 = vld [vmem:[%s458_s2] sm:$0x3]  ;;  %s374_s2 = smov [#allocation8]  }
  0x2f   :  { %270 = vmatpush1.bf16.msra.mxu0 %v269_v14  ;;  %284 = vmatpush1.bf16.msra.mxu1 %v269_v14  ;;  %v57_v33 = vld [vmem:[#allocation2 + $0x8] sm:$0xff]  ;;  %v218_v35 = vrot.slane %v213_v32, %v217_v31  ;;  %v59_v42 = vld [vmem:[#allocation2 + $0x18] sm:$0xff]  ;;  %v222_v55 = vrot.slane %v213_v32, %v221_v48  ;;  %s246_s13 = sshll.u32 %s374_s2, 4  ;;  %s247_s13 = int_to_ptr.vmem [resolvable:$true] %s246_s13 }
  0x30   :  { %272 = vmatprep.subr.bf16.mxu0 %v271_v15  ;;  %281 = vmatprep.subr.bf16.mxu1 %v271_v15  ;;  %v61_v34 = vld [vmem:[#allocation2 + $0x28] sm:$0xff]  ;;  %v63_v43 = vld [vmem:[#allocation2 + $0x38] sm:$0xff]  ;;  %s339_s14 = scalar_lea.vmem %s247_s13, 1024  ;;  %p344_p3 = scmp.lt.s32.totalorder %s247_s13, %s247_s13 }
  0x31   :  { %p340_p2 = scmp.ne.s32.totalorder %s247_s13, %s339_s14  ;;  %p345_p4 = scmp.lt.s32.totalorder %s339_s14, %s339_s14 }
  0x33   :  { %274 = vmatpush1.bf16.msra.mxu0 %v273_v20  ;;  %285 = vmatpush1.bf16.msra.mxu1 %v273_v20  ;;  %p346_p5 = por %p345_p4, %p344_p3 }
  0x34   :  { %276 = vmatprep.subr.bf16.mxu0 %v275_v21  ;;  %282 = vmatprep.subr.bf16.mxu1 %v275_v21 }
  0x35   :  { %p347_p6 = pnand %p346_p5, %p340_p2 }
  0x37   :  { %278 = vmatpush1.bf16.msra.mxu0 %v277_v24  ;;  %286 = vmatpush1.bf16.msra.mxu1 %v277_v24 }
  0x3a   :  { %259 = vmatmul.mubr.msk.f32.vlgmr.msra.gmra.mrb[0].mxu0 %vm48_vm0, %v64_v25  ;;  %261 = vmatmul.mubr.msk.f32.vlgmr.msra.gmra.mrb[0].mxu1 %vm48_vm0, %v66_v26 }
  0x3b   :  { %167 = vmatprep.mubr.f32.mxu0 %v373_v0  ;;  %179 = vmatprep.mubr.f32.mxu1 %v373_v0 }
  0x3e   :  { %260 = vmatmul.mubr.msk.f32.gmra.mrb[2].mxu0 %vm48_vm0, %v65_v27  ;;  %262 = vmatmul.mubr.msk.f32.gmra.mrb[2].mxu1 %vm48_vm0, %v67_v28 }
 0x10d   :  { %v163_v36 = vpop.f32.mrb[0].mxu0  ;;  %v175_v37 = vpop.f32.mrb[0].mxu1 }
 0x10e   :  { %v165_v38 = vpop.f32.mrb[1].mxu0  ;;  %v177_v39 = vpop.f32.mrb[1].mxu1  ;;  %v225_v44 = vadd.f32 %v218_v35, %v163_v36  ;;  %v229_v45 = vadd.f32 %v218_v35, %v175_v37 }
 0x10f   :  { %v187_v40 = vadd.f32 %v165_v38, %v57_v33  ;;  %v191_v41 = vadd.f32 %v177_v39, %v61_v34 }
 0x110   :  { %233 = vst [vmem:[#allocation8] sm:$0xff] %v225_v44  ;;  %237 = vst [vmem:[#allocation8 + $0x20] sm:$0xff] %v229_v45 }
 0x111   :  { %195 = vst.msk [vmem:[#allocation2 + $0x8] sm:$0xff] %vm48_vm0, %v187_v40  ;;  %199 = vst.msk [vmem:[#allocation2 + $0x28] sm:$0xff] %vm48_vm0, %v191_v41  ;;  %v169_v46 = vpop.f32.mrb[2].mxu0  ;;  %v181_v47 = vpop.f32.mrb[2].mxu1 }
 0x112   :  { %v171_v49 = vpop.f32.mrb[3].mxu0  ;;  %v183_v50 = vpop.f32.mrb[3].mxu1  ;;  %v227_v53 = vadd.f32 %v218_v35, %v169_v46  ;;  %v231_v54 = vadd.f32 %v218_v35, %v181_v47 }
 0x113   :  { %v189_v51 = vadd.f32 %v171_v49, %v59_v42  ;;  %v193_v52 = vadd.f32 %v183_v50, %v63_v43 }
 0x114   :  { %235 = vst [vmem:[#allocation8 + $0x10] sm:$0xff] %v227_v53  ;;  %239 = vst [vmem:[#allocation8 + $0x30] sm:$0xff] %v231_v54 }
 0x115   :  { %197 = vst.msk [vmem:[#allocation2 + $0x18] sm:$0xff] %vm48_vm0, %v189_v51  ;;  %201 = vst.msk [vmem:[#allocation2 + $0x38] sm:$0xff] %vm48_vm0, %v193_v52 }
 0x118   :  { %v206_v56 = vld [vmem:[#allocation2 + $0x8] sm:$0xff] }
 0x119   :  { %v210_v57 = vld [vmem:[#allocation2 + $0x28] sm:$0xff]  ;;  %v226_v58 = vadd.f32 %v222_v55, %v206_v56 }
 0x11a   :  { %v230_v59 = vadd.f32 %v222_v55, %v210_v57 }
 0x11b   :  { %234 = vst.msk [vmem:[#allocation8 + $0x8] sm:$0xff] %vm48_vm0, %v226_v58 }
 0x11c   :  { %238 = vst.msk [vmem:[#allocation8 + $0x28] sm:$0xff] %vm48_vm0, %v230_v59  ;;  %v208_v60 = vld [vmem:[#allocation2 + $0x18] sm:$0xff] }
 0x11d   :  { %v212_v61 = vld [vmem:[#allocation2 + $0x38] sm:$0xff]  ;;  %v228_v62 = vadd.f32 %v222_v55, %v208_v60 }
 0x11e   :  { %v232_v63 = vadd.f32 %v222_v55, %v212_v61 }
 0x11f   :  { %236 = vst.msk [vmem:[#allocation8 + $0x18] sm:$0xff] %vm48_vm0, %v228_v62 }
 0x120   :  { %240 = vst.msk [vmem:[#allocation8 + $0x38] sm:$0xff] %vm48_vm0, %v232_v63 }
 0x121   :  { %350 = shalt.err (!%p347_p6)
}
 0x122   :  { %s351_s17 = scalar_lea.hbm %s459_s3, 1024 }
 0x123   :  { %p352_p7 = scmp.ne.s32.totalorder %s459_s3, %s351_s17  ;;  %p355_p8 = scmp.lt.u32.totalorder %s351_s17, %s459_s3 }
 0x125   :  { %p357_p9 = pnand %p355_p8, %p352_p7 }
 0x127   :  { %360 = shalt.err (!%p357_p9)
}
 0x128   :  { %252 = dma.vmem_to_hbm [thread:$0]  %s247_s13, 1024, %s459_s3, [#allocation5], %s371_s0, %s371_s0, %s372_s9  }
 0x129   :  { %365 = dma.done.wait [#allocation5], 1024  }
 0x12a   :  { %366 = vsyncadd [#allocation5], 4294966272 }
 0x12b   :  { %256 = vsyncpa [#allocation4], 1 }
 0x12c   :  { %257 = vsyncpa [#allocation7], 1 }
 0x12d   :  { %258 = vsyncpa [#allocation5], 1 }

</bundles_post_ra>
